<compile_context>
chip_gen: v5e
topology: v5e:2x2
jax: 0.10.0
libtpu: 0.0.40
codegen_flags: <defaults>
</compile_context>

<pallas_src>
import functools

import jax
import jax.numpy as jnp
from jax import lax
from jax.experimental import pallas as pl
from jax.experimental.pallas import tpu as pltpu

LANE = 128
F32 = jnp.float32
BF16 = jnp.bfloat16


def _round_up(x, m):
    return (x + m - 1) // m * m


def _pad_lanes(x, width):
    pad = width - x.shape[-1]
    if pad == 0:
        return x
    return jnp.concatenate([x, jnp.zeros(x.shape[:-1] + (pad,), x.dtype)], axis=-1)


# ---------------------------------------------------------------------------
# Parameter preparation (host / trace-time): transpose, fuse GRU weights, bf16 cast
# ---------------------------------------------------------------------------
def pack_copy_decoder_params(params, max_oovs=12):
    V, E = params["embed"].shape
    H = params["ws_w"].shape[0]

    w_ih = jnp.asarray(params["w_ih"], F32)            # (3H, E+2H), rows [r;z;n]
    w_hh = jnp.asarray(params["w_hh"], F32)            # (3H, H)
    b_ih = jnp.asarray(params["b_ih"], F32)
    b_hh = jnp.asarray(params["b_hh"], F32)
    wi_t, wh_t = w_ih.T, w_hh.T                        # (E+2H, 3H), (H, 3H)
    EI = E + 2 * H

    # Fused GRU weight for x_full = [emb, weighted, prev_state]  (B, E+3H):
    #   cols [0:2H]  -> r,z pre-activation (gi + gh)
    #   cols [2H:3H] -> gi_n (input part of n-gate)
    #   cols [3H:4H] -> gh_n (hidden part of n-gate)
    w_gru = jnp.zeros((E + 3 * H, 4 * H), F32)
    w_gru = w_gru.at[:EI, 0:2 * H].set(wi_t[:, 0:2 * H])
    w_gru = w_gru.at[:EI, 2 * H:3 * H].set(wi_t[:, 2 * H:3 * H])
    w_gru = w_gru.at[EI:, 0:2 * H].set(wh_t[:, 0:2 * H])
    w_gru = w_gru.at[EI:, 3 * H:4 * H].set(wh_t[:, 2 * H:3 * H])
    b_gru = jnp.concatenate(
        [b_ih[0:2 * H] + b_hh[0:2 * H], b_ih[2 * H:3 * H], b_hh[2 * H:3 * H]])

    return {
        # MXU operands in bf16, biases in f32, each at its own natural size.
        "w_gru": w_gru.astype(BF16),                                   # (E+3H, 4H)
        "b_gru": b_gru.reshape(1, -1),                                 # (1, 4H) f32
        "ws_wT": jnp.asarray(params["ws_w"], F32).T.astype(BF16),      # (2H, H)
        "ws_b": jnp.asarray(params["ws_b"], F32).reshape(1, -1),       # (1, H)
        "wo_wT": jnp.asarray(params["wo_w"], F32).T.astype(BF16),      # (H, V)
        "wo_b": jnp.asarray(params["wo_b"], F32).reshape(1, -1),       # (1, V)
        "wc_wT": jnp.asarray(params["wc_w"], F32).T.astype(BF16),      # (2H, H)
        "wc_b": jnp.asarray(params["wc_b"], F32).reshape(1, -1),       # (1, H)
        "embed": jnp.asarray(params["embed"], F32),                    # (V, E)
        "V": V, "E": E, "H": H, "max_oovs": max_oovs,
    }


# ---------------------------------------------------------------------------
# Shared per-step compute (GRU + scores + softmax + copy attention)
# Suffix `_b` marks bf16 MXU operands; all accumulation / elementwise math is f32.
# ---------------------------------------------------------------------------
def _decoder_step(emb_b, weighted, prev_state, enc_b, idx_match,
                  sc_t_b, mask, one_hot_b, w_gru, b_gru, wo_wT, wo_b,
                  *, B, S, H, V, VT):
    # ---- single-matmul GRU step (PyTorch gate order r, z, n) ----
    x_full = jnp.concatenate(
        [emb_b, weighted.astype(BF16), prev_state.astype(BF16)], axis=1)   # (B, E+3H)
    g = jnp.dot(x_full, w_gru, preferred_element_type=F32) + b_gru          # (B, 4H)
    r = jax.nn.sigmoid(g[:, 0:H])
    z = jax.nn.sigmoid(g[:, H:2 * H])
    n = jnp.tanh(g[:, 2 * H:3 * H] + r * g[:, 3 * H:4 * H])
    state = (1.0 - z) * n + z * prev_state                                  # (B, H) f32
    state_b = state.astype(BF16)

    # ---- generation + copy scores (both on the MXU) ----
    score_g = jnp.dot(state_b, wo_wT, preferred_element_type=F32) + wo_b    # (B, V)
    sc = jnp.einsum("bqh,bsh->bqs", state_b[:, None, :], sc_t_b,
                    preferred_element_type=F32)[:, 0, :]                    # (B, S)
    score_c = jnp.tanh(sc) + mask

    # ---- joint softmax over [score_g ; score_c] ----
    score = jnp.concatenate([score_g, score_c], axis=1)                     # (B, V+S)
    m = jnp.max(score, axis=1, keepdims=True)
    e = jnp.exp(score - m)
    inv = pl.reciprocal(jnp.sum(e, axis=1, keepdims=True), approx=True)
    probs = e * inv
    prob_g = probs[:, :V]
    prob_c = probs[:, V:]

    # ---- copy distribution scatter as an MXU matmul against the bf16 one-hot ----
    prob_g_ext = jnp.concatenate(
        [prob_g, jnp.full((B, VT - V), 0.0001, F32)], axis=1)               # (B, VT)
    prob_c_to_g = jnp.einsum("bqs,bsv->bqv", prob_c.astype(BF16)[:, None, :],
                             one_hot_b, preferred_element_type=F32)[:, 0, :]
    out = prob_g_ext + prob_c_to_g

    # ---- attention over source positions matching the current input token ----
    denom = jnp.maximum(jnp.sum(idx_match, axis=1, keepdims=True), 1.0)
    attn = prob_c * (idx_match / denom)
    new_weighted = jnp.einsum("bqs,bsk->bqk", attn.astype(BF16)[:, None, :],
                              enc_b, preferred_element_type=F32)[:, 0, :]   # (B, 2H)
    return out, state, new_weighted


# ---------------------------------------------------------------------------
# Single-step kernel (mirrors module forward(); compiled once per order==0 flag)
# ---------------------------------------------------------------------------
def _single_step_kernel(dims, is_first, *refs):
    B, S, H, E, V, VT = dims
    if is_first:
        (ids_ref, emb_ref, enc_ref, eidx_ref,
         w_gru_ref, b_gru_ref, ws_wT_ref, ws_b_ref,
         wo_wT_ref, wo_b_ref, wc_wT_ref, wc_b_ref,
         out_ref, state_ref, wout_ref) = refs
    else:
        (ids_ref, emb_ref, enc_ref, eidx_ref, prev_state_ref, weighted_ref,
         w_gru_ref, b_gru_ref,
         wo_wT_ref, wo_b_ref, wc_wT_ref, wc_b_ref,
         out_ref, state_ref, wout_ref) = refs

    enc = enc_ref[...]                       # (B, S, 2H) f32
    enc_b = enc.astype(BF16)
    eidx = eidx_ref[...]                     # (B, S) int32

    if is_first:
        last_b = enc[:, S - 1, :].astype(BF16)
        prev_state = (jnp.dot(last_b, ws_wT_ref[...],
                              preferred_element_type=F32) + ws_b_ref[...])
        weighted = jnp.zeros((B, 2 * H), F32)
    else:
        prev_state = prev_state_ref[...]
        weighted = weighted_ref[...]

    # step-invariant terms (recomputed here; cached in scratch in the fused kernel)
    sc = jnp.dot(enc.reshape(B * S, 2 * H).astype(BF16), wc_wT_ref[...],
                 preferred_element_type=F32) + wc_b_ref[...]
    sc_t_b = jnp.tanh(sc).reshape(B, S, H).astype(BF16)
    mask = jnp.where(eidx == 0, jnp.float32(-1000.0), jnp.float32(0.0))
    vt_iota = lax.broadcasted_iota(jnp.int32, (B, S, VT), 2)
    one_hot_b = (eidx[:, :, None] == vt_iota).astype(BF16)

    # token-id match mask (ids live in SMEM)
    id_rows = [jnp.full((1, S), ids_ref[b], jnp.int32) for b in range(B)]
    idx_match = (eidx == jnp.concatenate(id_rows, axis=0)).astype(F32)

    out, state, new_w = _decoder_step(
        emb_ref[...], weighted, prev_state, enc_b, idx_match,
        sc_t_b, mask, one_hot_b,
        w_gru_ref[...], b_gru_ref[...], wo_wT_ref[...], wo_b_ref[...],
        B=B, S=S, H=H, V=V, VT=VT)

    out_ref[...] = _pad_lanes(out, out_ref.shape[-1])
    state_ref[...] = _pad_lanes(state, state_ref.shape[-1])
    wout_ref[...] = _pad_lanes(new_w, wout_ref.shape[-1])


@functools.lru_cache(maxsize=None)
def _build_single_step(is_first, B, S, H, E, V, VT):
    OUTW, STW, WW = _round_up(VT, LANE), _round_up(H, LANE), _round_up(2 * H, LANE)
    kernel = functools.partial(_single_step_kernel, (B, S, H, E, V, VT), is_first)
    vmem = pl.BlockSpec(memory_space=pltpu.MemorySpace.VMEM)
    smem = pl.BlockSpec(memory_space=pltpu.MemorySpace.SMEM)
    n_weights = 8 if is_first else 6
    in_specs = ([smem, vmem, vmem, vmem]
                + ([] if is_first else [vmem, vmem])
                + [vmem] * n_weights)
    call = pl.pallas_call(
        kernel,
        out_shape=(jax.ShapeDtypeStruct((B, OUTW), F32),
                   jax.ShapeDtypeStruct((B, STW), F32),
                   jax.ShapeDtypeStruct((B, WW), F32)),
        in_specs=in_specs,
        out_specs=(vmem, vmem, vmem),
    )
    return jax.jit(call)


def copy_decoder_forward(packed, input_idx, encoded, encoded_idx,
                         prev_state, weighted, order):
    """One decode step; mirrors CopyDecoder.forward. `order` only selects init."""
    B, S, H2 = encoded.shape
    H, E, V = packed["H"], packed["E"], packed["V"]
    VT = V + packed["max_oovs"]
    is_first = (int(order) == 0)
    call = _build_single_step(is_first, B, S, H, E, V, VT)

    ids = jnp.asarray(input_idx, jnp.int32).reshape(B)
    # Only the B needed embedding rows are moved into the kernel (not the table).
    emb = jnp.take(packed["embed"], ids, axis=0).astype(BF16)                # (B, E)
    enc = jnp.asarray(encoded, F32)
    eidx = jnp.asarray(encoded_idx, jnp.int32)
    if is_first:
        args = (ids, emb, enc, eidx,
                packed["w_gru"], packed["b_gru"], packed["ws_wT"], packed["ws_b"],
                packed["wo_wT"], packed["wo_b"], packed["wc_wT"], packed["wc_b"])
    else:
        args = (ids, emb, enc, eidx,
                jnp.asarray(prev_state, F32).reshape(B, H),
                jnp.asarray(weighted, F32).reshape(B, H2),
                packed["w_gru"], packed["b_gru"],
                packed["wo_wT"], packed["wo_b"], packed["wc_wT"], packed["wc_b"])
    out_p, state_p, w_p = call(*args)
    return out_p[:, None, :VT], state_p[:, :H], w_p[:, None, :H2]


# ---------------------------------------------------------------------------
# Fused multi-step decode kernel: grid over chunks of decode steps, fori_loop over
# steps within a chunk.  Weights / encoded / caches stay VMEM-resident; state and
# weighted are carried in scratch; step-invariants are computed once at chunk 0.
# ---------------------------------------------------------------------------
def _fused_decode_kernel(dims, Tc, T_total, *refs):
    B, S, H, E, V, VT = dims
    (ids_ref,
     enc_ref, eidx_ref,
     w_gru_ref, b_gru_ref, ws_wT_ref, ws_b_ref,
     wo_wT_ref, wo_b_ref, wc_wT_ref, wc_b_ref, embed_ref,
     out_ref, state_out_ref, wout_ref,
     state_sc, weighted_sc, sc_sc, mask_sc, onehot_sc) = refs

    c = pl.program_id(0)
    enc = enc_ref[...]                       # (B, S, 2H) f32
    enc_b = enc.astype(BF16)                 # MXU-operand copy, hoisted per chunk
    eidx = eidx_ref[...]                     # (B, S) int32

    @pl.when(c == 0)
    def _init():
        last_b = enc[:, S - 1, :].astype(BF16)
        state_sc[...] = (jnp.dot(last_b, ws_wT_ref[...],
                                 preferred_element_type=F32) + ws_b_ref[...])
        weighted_sc[...] = jnp.zeros((B, 2 * H), F32)
        sc = jnp.dot(enc.reshape(B * S, 2 * H).astype(BF16), wc_wT_ref[...],
                     preferred_element_type=F32) + wc_b_ref[...]
        sc_sc[...] = jnp.tanh(sc).reshape(B, S, H).astype(BF16)
        mask_sc[...] = jnp.where(eidx == 0, jnp.float32(-1000.0), jnp.float32(0.0))
        vt_iota = lax.broadcasted_iota(jnp.int32, (B, S, VT), 2)
        onehot_sc[...] = (eidx[:, :, None] == vt_iota).astype(BF16)

    # Resident weights and cached step-invariants, loaded once per chunk.
    w_gru, b_gru = w_gru_ref[...], b_gru_ref[...]
    wo_wT, wo_b = wo_wT_ref[...], wo_b_ref[...]
    sc_t_b = sc_sc[...]
    mask = mask_sc[...]
    one_hot_b = onehot_sc[...]

    base = c * Tc
    steps = jnp.minimum(Tc, T_total - base)  # partial last chunk

    def step_body(tc, carry):
        t = base + tc
        # per-row embedding gather from the (V, E) table + id match build
        emb_rows, id_rows = [], []
        for b in range(B):
            tid = ids_ref[t * B + b]                         # SMEM scalar
            emb_rows.append(embed_ref[pl.ds(tid, 1), :])     # (1, E)
            id_rows.append(jnp.full((1, S), tid, jnp.int32))
        emb_b = jnp.concatenate(emb_rows, axis=0).astype(BF16)       # (B, E)
        idx_match = (eidx == jnp.concatenate(id_rows, axis=0)).astype(F32)

        out, state, new_w = _decoder_step(
            emb_b, weighted_sc[...], state_sc[...], enc_b, idx_match,
            sc_t_b, mask, one_hot_b, w_gru, b_gru, wo_wT, wo_b,
            B=B, S=S, H=H, V=V, VT=VT)

        state_sc[...] = state
        weighted_sc[...] = new_w
        out_ref[tc] = _pad_lanes(out, out_ref.shape[-1])
        return carry

    lax.fori_loop(0, steps, step_body, 0)

    state_out_ref[...] = _pad_lanes(state_sc[...], state_out_ref.shape[-1])
    wout_ref[...] = _pad_lanes(weighted_sc[...], wout_ref.shape[-1])


@functools.lru_cache(maxsize=None)
def _build_fused_decode(T, Tc, B, S, H, E, V, VT):
    n_chunks = pl.cdiv(T, Tc)
    OUTW, STW, WW = _round_up(VT, LANE), _round_up(H, LANE), _round_up(2 * H, LANE)
    EI3 = E + 3 * H
    kernel = functools.partial(_fused_decode_kernel, (B, S, H, E, V, VT), Tc, T)

    def const(shape):
        return pl.BlockSpec(shape, lambda c, ids, _n=len(shape): (0,) * _n)

    grid_spec = pltpu.PrefetchScalarGridSpec(
        num_scalar_prefetch=1,                       # step token ids -> SMEM
        grid=(n_chunks,),
        in_specs=[
            const((B, S, 2 * H)),                    # encoded (resident)
            const((B, S)),                           # encoded_idx
            const((EI3, 4 * H)),                     # w_gru   (bf16)
            const((1, 4 * H)),                       # b_gru   (f32)
            const((2 * H, H)),                       # ws_wT   (bf16)
            const((1, H)),                           # ws_b
            const((H, V)),                           # wo_wT   (bf16)
            const((1, V)),                           # wo_b
            const((2 * H, H)),                       # wc_wT   (bf16)
            const((1, H)),                           # wc_b
            const((V, E)),                           # embedding table (f32)
        ],
        out_specs=[
            pl.BlockSpec((Tc, B, OUTW), lambda c, ids: (c, 0, 0)),   # per-step probs
            pl.BlockSpec((B, STW), lambda c, ids: (0, 0)),           # final state
            pl.BlockSpec((B, WW), lambda c, ids: (0, 0)),            # final weighted
        ],
        scratch_shapes=[
            pltpu.VMEM((B, H), F32),           # carried state
            pltpu.VMEM((B, 2 * H), F32),       # carried weighted
            pltpu.VMEM((B, S, H), BF16),       # cached tanh(Wc(encoded))
            pltpu.VMEM((B, S), F32),           # cached pad mask
            pltpu.VMEM((B, S, VT), BF16),      # cached copy one-hot (bf16, MXU operand)
        ])
    call = pl.pallas_call(
        kernel,
        grid_spec=grid_spec,
        out_shape=(jax.ShapeDtypeStruct((n_chunks * Tc, B, OUTW), F32),
                   jax.ShapeDtypeStruct((B, STW), F32),
                   jax.ShapeDtypeStruct((B, WW), F32)),
        compiler_params=pltpu.CompilerParams(dimension_semantics=("arbitrary",)),
    )
    return jax.jit(call)


def copy_decoder_decode(packed, step_ids, encoded, encoded_idx, chunk_steps=8):
    """T fused decode steps == calling the module with order=0..T-1 (teacher-forced)."""
    T, B = step_ids.shape
    S, H2 = encoded.shape[1], encoded.shape[2]
    H, E, V = packed["H"], packed["E"], packed["V"]
    VT = V + packed["max_oovs"]
    Tc = max(1, min(int(chunk_steps), T))
    call = _build_fused_decode(T, Tc, B, S, H, E, V, VT)
    out_p, state_p, w_p = call(
        jnp.asarray(step_ids, jnp.int32).reshape(T * B),
        jnp.asarray(encoded, F32),
        jnp.asarray(encoded_idx, jnp.int32),
        packed["w_gru"], packed["b_gru"], packed["ws_wT"], packed["ws_b"],
        packed["wo_wT"], packed["wo_b"], packed["wc_wT"], packed["wc_b"],
        packed["embed"])
    return out_p[:T, :, :VT], state_p[:, :H], w_p[:, None, :H2]


# ---------------------------------------------------------------------------
# Pure-JAX reference (mirrors the PyTorch forward exactly) for validation
# ---------------------------------------------------------------------------
def copy_decoder_reference(params, input_idx, encoded, encoded_idx,
                           prev_state, weighted, order, max_oovs=12):
    B, S, H2 = encoded.shape
    H = H2 // 2
    V, _ = params["embed"].shape
    VT = V + max_oovs
    encoded = encoded.astype(jnp.float32)
    weighted = jnp.asarray(weighted, jnp.float32).reshape(B, H2)

    if order == 0:
        prev_state = encoded[:, -1, :] @ params["ws_w"].T + params["ws_b"]
        weighted = jnp.zeros((B, H2), jnp.float32)

    emb = params["embed"][input_idx]
    x = jnp.concatenate([emb, weighted], axis=1)
    gi = x @ params["w_ih"].T + params["b_ih"]
    gh = prev_state @ params["w_hh"].T + params["b_hh"]
    r = jax.nn.sigmoid(gi[:, :H] + gh[:, :H])
    z = jax.nn.sigmoid(gi[:, H:2 * H] + gh[:, H:2 * H])
    n = jnp.tanh(gi[:, 2 * H:] + r * gh[:, 2 * H:])
    state = (1.0 - z) * n + z * prev_state

    score_g = state @ params["wo_w"].T + params["wo_b"]
    sc = jnp.tanh(encoded.reshape(-1, H2) @ params["wc_w"].T + params["wc_b"])
    sc = sc.reshape(B, S, H)
    score_c = jnp.tanh(jnp.einsum("bsh,bh->bs", sc, state))
    score_c = score_c + jnp.where(encoded_idx == 0, -1000.0, 0.0)

    score = jnp.concatenate([score_g, score_c], axis=1)
    probs = jax.nn.softmax(score, axis=1)
    prob_g = probs[:, :V]
    prob_c = probs[:, V:]
    prob_g = jnp.concatenate([prob_g, jnp.full((B, max_oovs), 0.0001)], axis=1)

    one_hot = jax.nn.one_hot(encoded_idx, VT, dtype=jnp.float32)
    prob_c_to_g = jnp.einsum("bs,bsv->bv", prob_c, one_hot)
    out = prob_g + prob_c_to_g

    idx_from_input = (encoded_idx == input_idx[:, None]).astype(jnp.float32)
    row_sum = jnp.sum(idx_from_input, axis=1, keepdims=True)
    idx_from_input = jnp.where(row_sum > 1.0, idx_from_input / row_sum, idx_from_input)
    attn = prob_c * idx_from_input
    new_weighted = jnp.einsum("bs,bsk->bk", attn, encoded)

    return out[:, None, :], state, new_weighted[:, None, :]


def make_params(key, vocab_size, embed_size, hidden_size):
    ks = jax.random.split(key, 11)
    s = 0.1
    return {
        "embed": s * jax.random.normal(ks[0], (vocab_size, embed_size), jnp.float32),
        "w_ih": s * jax.random.normal(ks[1], (3 * hidden_size, embed_size + 2 * hidden_size), jnp.float32),
        "w_hh": s * jax.random.normal(ks[2], (3 * hidden_size, hidden_size), jnp.float32),
        "b_ih": s * jax.random.normal(ks[3], (3 * hidden_size,), jnp.float32),
        "b_hh": s * jax.random.normal(ks[4], (3 * hidden_size,), jnp.float32),
        "ws_w": s * jax.random.normal(ks[5], (hidden_size, 2 * hidden_size), jnp.float32),
        "ws_b": s * jax.random.normal(ks[6], (hidden_size,), jnp.float32),
        "wo_w": s * jax.random.normal(ks[7], (vocab_size, hidden_size), jnp.float32),
        "wo_b": s * jax.random.normal(ks[8], (vocab_size,), jnp.float32),
        "wc_w": s * jax.random.normal(ks[9], (hidden_size, 2 * hidden_size), jnp.float32),
        "wc_b": s * jax.random.normal(ks[10], (hidden_size,), jnp.float32),
    }


# TODO(synk): the PyTorch module's timing/printing helpers (elapsed_time, to_cuda)
# are host-side no-ops and are intentionally not reproduced in the kernel.

if __name__ == "__main__":
    B, SEQ = 2, 8
    VOCAB, EMBED, HIDDEN, MAX_OOVS = 32, 16, 16, 12

    key = jax.random.PRNGKey(0)
    pkey, ekey, ikey = jax.random.split(key, 3)
    params = make_params(pkey, VOCAB, EMBED, HIDDEN)
    packed = pack_copy_decoder_params(params, MAX_OOVS)

    encoded = jax.random.normal(ekey, (B, SEQ, 2 * HIDDEN), jnp.float32)
    encoded_idx = jnp.array([[3, 7, 0, 3, 9, 0, 1, 4],
                             [5, 2, 5, 0, 5, 8, 0, 6]], dtype=jnp.int32)
    input_idx = jnp.array([3, 5], dtype=jnp.int32)

    # bf16 MXU operands + approximate softmax reciprocal -> slightly looser tolerance
    TOL = dict(atol=2e-2, rtol=2e-2)

    # ---- single-step path: order == 0 ----
    out0, state0, w0 = copy_decoder_forward(
        packed, input_idx, encoded, encoded_idx, None, None, order=0)
    jax.block_until_ready((out0, state0, w0))
    ro0, rs0, rw0 = copy_decoder_reference(
        params, input_idx, encoded, encoded_idx,
        jnp.zeros((B, HIDDEN)), jnp.zeros((B, 1, 2 * HIDDEN)), order=0, max_oovs=MAX_OOVS)
    assert jnp.allclose(out0, ro0, **TOL)
    assert jnp.allclose(state0, rs0, **TOL)
    assert jnp.allclose(w0, rw0, **TOL)

    # ---- single-step path: order > 0 (same compiled variant for all orders > 0) ----
    out1, state1, w1 = copy_decoder_forward(
        packed, input_idx, encoded, encoded_idx, state0, w0, order=1)
    jax.block_until_ready((out1, state1, w1))
    ro1, rs1, rw1 = copy_decoder_reference(
        params, input_idx, encoded, encoded_idx, rs0, rw0, order=1, max_oovs=MAX_OOVS)
    assert jnp.allclose(out1, ro1, **TOL)
    assert jnp.allclose(state1, rs1, **TOL)
    assert jnp.allclose(w1, rw1, **TOL)

    # ---- fused multi-step decode (chunked grid; exercises a partial last chunk) ----
    T = 6
    step_ids = jax.random.randint(ikey, (T, B), 0, VOCAB, dtype=jnp.int32)
    outs_f, state_f, w_f = copy_decoder_decode(
        packed, step_ids, encoded, encoded_idx, chunk_steps=4)
    jax.block_until_ready((outs_f, state_f, w_f))

    st, wt = jnp.zeros((B, HIDDEN)), jnp.zeros((B, 1, 2 * HIDDEN))
    ref_outs = []
    for t in range(T):
        o, st, wt = copy_decoder_reference(
            params, step_ids[t], encoded, encoded_idx, st, wt, order=t, max_oovs=MAX_OOVS)
        ref_outs.append(o[:, 0, :])
    ref_outs = jnp.stack(ref_outs)                       # (T, B, V+MAX_OOVS)
    assert jnp.allclose(outs_f, ref_outs, **TOL)
    assert jnp.allclose(state_f, st, **TOL)
    assert jnp.allclose(w_f, wt, **TOL)

    print("KERNEL_OK")
</pallas_src>

<mosaic_0001>
module attributes {stable_mosaic.version = 11 : i64} {
  func.func @_single_step_kernel(%arg0: memref<2xi32, #tpu.memory_space<smem>>, %arg1: memref<2x16xbf16, #tpu.memory_space<vmem>>, %arg2: memref<2x8x32xf32, #tpu.memory_space<vmem>>, %arg3: memref<2x8xi32, #tpu.memory_space<vmem>>, %arg4: memref<64x64xbf16, #tpu.memory_space<vmem>>, %arg5: memref<1x64xf32, #tpu.memory_space<vmem>>, %arg6: memref<32x16xbf16, #tpu.memory_space<vmem>>, %arg7: memref<1x16xf32, #tpu.memory_space<vmem>>, %arg8: memref<16x32xbf16, #tpu.memory_space<vmem>>, %arg9: memref<1x32xf32, #tpu.memory_space<vmem>>, %arg10: memref<32x16xbf16, #tpu.memory_space<vmem>>, %arg11: memref<1x16xf32, #tpu.memory_space<vmem>>, %arg12: memref<2x128xf32, #tpu.memory_space<vmem>>, %arg13: memref<2x128xf32, #tpu.memory_space<vmem>>, %arg14: memref<2x128xf32, #tpu.memory_space<vmem>>) attributes {dimension_semantics = [], scalar_prefetch = 0 : i64, scratch_operands = 0 : i64, tpu.core_type = #tpu.core_type<tc>} {
    %c0 = arith.constant 0 : index
    %c0_0 = arith.constant 0 : index
    %c0_1 = arith.constant 0 : index
    %0 = vector.load %arg2[%c0, %c0_0, %c0_1] : memref<2x8x32xf32, #tpu.memory_space<vmem>>, vector<2x8x32xf32>
    %1 = arith.truncf %0 : vector<2x8x32xf32> to vector<2x8x32xbf16>
    %c0_2 = arith.constant 0 : index
    %c0_3 = arith.constant 0 : index
    %2 = vector.load %arg3[%c0_2, %c0_3] : memref<2x8xi32, #tpu.memory_space<vmem>>, vector<2x8xi32>
    %3 = vector.extract_strided_slice %0 {offsets = [0, 7, 0], sizes = [2, 1, 32], strides = [1, 1, 1]} : vector<2x8x32xf32> to vector<2x1x32xf32>
    %4 = vector.shape_cast %3 : vector<2x1x32xf32> to vector<2x32xf32>
    %5 = arith.truncf %4 : vector<2x32xf32> to vector<2x32xbf16>
    %c0_4 = arith.constant 0 : index
    %c0_5 = arith.constant 0 : index
    %6 = vector.load %arg6[%c0_4, %c0_5] : memref<32x16xbf16, #tpu.memory_space<vmem>>, vector<32x16xbf16>
    %cst = arith.constant dense<0.000000e+00> : vector<2x16xf32>
    %7 = tpu.matmul %5, %6, %cst {dimension_numbers = #tpu.dot_dimension_numbers<[1], [0], [0], [1], [0, 0, 1, 1], [], []>} : vector<2x32xbf16>, vector<32x16xbf16>, vector<2x16xf32> -> vector<2x16xf32>
    %c0_6 = arith.constant 0 : index
    %c0_7 = arith.constant 0 : index
    %8 = vector.load %arg7[%c0_6, %c0_7] : memref<1x16xf32, #tpu.memory_space<vmem>>, vector<1x16xf32>
    %9 = vector.broadcast %8 : vector<1x16xf32> to vector<2x16xf32>
    %10 = arith.addf %7, %9 : vector<2x16xf32>
    %cst_8 = arith.constant 0.000000e+00 : f32
    %11 = vector.broadcast %cst_8 : f32 to vector<2x32xf32>
    %12 = vector.shape_cast %0 : vector<2x8x32xf32> to vector<16x32xf32>
    %13 = arith.truncf %12 : vector<16x32xf32> to vector<16x32xbf16>
    %c0_9 = arith.constant 0 : index
    %c0_10 = arith.constant 0 : index
    %14 = vector.load %arg10[%c0_9, %c0_10] : memref<32x16xbf16, #tpu.memory_space<vmem>>, vector<32x16xbf16>
    %cst_11 = arith.constant dense<0.000000e+00> : vector<16x16xf32>
    %15 = tpu.matmul %13, %14, %cst_11 {dimension_numbers = #tpu.dot_dimension_numbers<[1], [0], [0], [1], [0, 0, 1, 1], [], []>} : vector<16x32xbf16>, vector<32x16xbf16>, vector<16x16xf32> -> vector<16x16xf32>
    %c0_12 = arith.constant 0 : index
    %c0_13 = arith.constant 0 : index
    %16 = vector.load %arg11[%c0_12, %c0_13] : memref<1x16xf32, #tpu.memory_space<vmem>>, vector<1x16xf32>
    %17 = vector.broadcast %16 : vector<1x16xf32> to vector<16x16xf32>
    %18 = arith.addf %15, %17 : vector<16x16xf32>
    %19 = math.tanh %18 : vector<16x16xf32>
    %20 = vector.shape_cast %19 : vector<16x16xf32> to vector<2x8x16xf32>
    %21 = arith.truncf %20 : vector<2x8x16xf32> to vector<2x8x16xbf16>
    %c0_i32 = arith.constant 0 : i32
    %22 = vector.broadcast %c0_i32 : i32 to vector<2x8xi32>
    %23 = arith.cmpi eq, %2, %22 : vector<2x8xi32>
    %cst_14 = arith.constant -1.000000e+03 : f32
    %cst_15 = arith.constant 0.000000e+00 : f32
    %24 = vector.broadcast %cst_14 : f32 to vector<2x8xf32>
    %25 = vector.broadcast %cst_15 : f32 to vector<2x8xf32>
    %26 = arith.select %23, %24, %25 : vector<2x8xi1>, vector<2x8xf32>
    %27 = tpu.iota {dimensions = array<i32: 2>} : vector<2x8x44xi32>
    %28 = vector.shape_cast %2 : vector<2x8xi32> to vector<2x8x1xi32>
    %29 = vector.broadcast %28 : vector<2x8x1xi32> to vector<2x8x44xi32>
    %30 = arith.cmpi eq, %29, %27 : vector<2x8x44xi32>
    %31 = arith.extui %30 : vector<2x8x44xi1> to vector<2x8x44xi32>
    %32 = arith.sitofp %31 : vector<2x8x44xi32> to vector<2x8x44xf32>
    %33 = arith.truncf %32 : vector<2x8x44xf32> to vector<2x8x44xbf16>
    %c0_16 = arith.constant 0 : index
    %34 = memref.load %arg0[%c0_16] : memref<2xi32, #tpu.memory_space<smem>>
    %35 = vector.broadcast %34 : i32 to vector<1x8xi32>
    %c1 = arith.constant 1 : index
    %36 = memref.load %arg0[%c1] : memref<2xi32, #tpu.memory_space<smem>>
    %37 = vector.broadcast %36 : i32 to vector<1x8xi32>
    %38 = tpu.concatenate %35, %37 in 0 : vector<1x8xi32>, vector<1x8xi32> -> vector<2x8xi32>
    %39 = arith.cmpi eq, %2, %38 : vector<2x8xi32>
    %40 = arith.extui %39 : vector<2x8xi1> to vector<2x8xi32>
    %41 = arith.sitofp %40 : vector<2x8xi32> to vector<2x8xf32>
    %c0_17 = arith.constant 0 : index
    %c0_18 = arith.constant 0 : index
    %42 = vector.load %arg1[%c0_17, %c0_18] : memref<2x16xbf16, #tpu.memory_space<vmem>>, vector<2x16xbf16>
    %c0_19 = arith.constant 0 : index
    %c0_20 = arith.constant 0 : index
    %43 = vector.load %arg4[%c0_19, %c0_20] : memref<64x64xbf16, #tpu.memory_space<vmem>>, vector<64x64xbf16>
    %c0_21 = arith.constant 0 : index
    %c0_22 = arith.constant 0 : index
    %44 = vector.load %arg5[%c0_21, %c0_22] : memref<1x64xf32, #tpu.memory_space<vmem>>, vector<1x64xf32>
    %c0_23 = arith.constant 0 : index
    %c0_24 = arith.constant 0 : index
    %45 = vector.load %arg8[%c0_23, %c0_24] : memref<16x32xbf16, #tpu.memory_space<vmem>>, vector<16x32xbf16>
    %c0_25 = arith.constant 0 : index
    %c0_26 = arith.constant 0 : index
    %46 = vector.load %arg9[%c0_25, %c0_26] : memref<1x32xf32, #tpu.memory_space<vmem>>, vector<1x32xf32>
    %47 = arith.truncf %11 : vector<2x32xf32> to vector<2x32xbf16>
    %48 = arith.truncf %10 : vector<2x16xf32> to vector<2x16xbf16>
    %49 = tpu.concatenate %42, %47, %48 in 1 : vector<2x16xbf16>, vector<2x32xbf16>, vector<2x16xbf16> -> vector<2x64xbf16>
    %cst_27 = arith.constant dense<0.000000e+00> : vector<2x64xf32>
    %50 = tpu.matmul %49, %43, %cst_27 {dimension_numbers = #tpu.dot_dimension_numbers<[1], [0], [0], [1], [0, 0, 1, 1], [], []>} : vector<2x64xbf16>, vector<64x64xbf16>, vector<2x64xf32> -> vector<2x64xf32>
    %51 = vector.broadcast %44 : vector<1x64xf32> to vector<2x64xf32>
    %52 = arith.addf %50, %51 : vector<2x64xf32>
    %53 = vector.extract_strided_slice %52 {offsets = [0, 0], sizes = [2, 16], strides = [1, 1]} : vector<2x64xf32> to vector<2x16xf32>
    %54 = arith.negf %53 : vector<2x16xf32>
    %55 = math.exp %54 : vector<2x16xf32>
    %cst_28 = arith.constant 1.000000e+00 : f32
    %56 = vector.broadcast %cst_28 : f32 to vector<2x16xf32>
    %57 = arith.addf %56, %55 : vector<2x16xf32>
    %58 = arith.divf %56, %57 : vector<2x16xf32>
    %59 = vector.extract_strided_slice %52 {offsets = [0, 16], sizes = [2, 16], strides = [1, 1]} : vector<2x64xf32> to vector<2x16xf32>
    %60 = arith.negf %59 : vector<2x16xf32>
    %61 = math.exp %60 : vector<2x16xf32>
    %cst_29 = arith.constant 1.000000e+00 : f32
    %62 = vector.broadcast %cst_29 : f32 to vector<2x16xf32>
    %63 = arith.addf %62, %61 : vector<2x16xf32>
    %64 = arith.divf %62, %63 : vector<2x16xf32>
    %65 = vector.extract_strided_slice %52 {offsets = [0, 32], sizes = [2, 16], strides = [1, 1]} : vector<2x64xf32> to vector<2x16xf32>
    %66 = vector.extract_strided_slice %52 {offsets = [0, 48], sizes = [2, 16], strides = [1, 1]} : vector<2x64xf32> to vector<2x16xf32>
    %67 = arith.mulf %58, %66 : vector<2x16xf32>
    %68 = arith.addf %65, %67 : vector<2x16xf32>
    %69 = math.tanh %68 : vector<2x16xf32>
    %cst_30 = arith.constant 1.000000e+00 : f32
    %70 = vector.broadcast %cst_30 : f32 to vector<2x16xf32>
    %71 = arith.subf %70, %64 : vector<2x16xf32>
    %72 = arith.mulf %71, %69 : vector<2x16xf32>
    %73 = arith.mulf %64, %10 : vector<2x16xf32>
    %74 = arith.addf %72, %73 : vector<2x16xf32>
    %75 = arith.truncf %74 : vector<2x16xf32> to vector<2x16xbf16>
    %cst_31 = arith.constant dense<0.000000e+00> : vector<2x32xf32>
    %76 = tpu.matmul %75, %45, %cst_31 {dimension_numbers = #tpu.dot_dimension_numbers<[1], [0], [0], [1], [0, 0, 1, 1], [], []>} : vector<2x16xbf16>, vector<16x32xbf16>, vector<2x32xf32> -> vector<2x32xf32>
    %77 = vector.broadcast %46 : vector<1x32xf32> to vector<2x32xf32>
    %78 = arith.addf %76, %77 : vector<2x32xf32>
    %79 = vector.shape_cast %75 : vector<2x16xbf16> to vector<2x1x16xbf16>
    "tpu.trace_start"() <{level = 10 : i32, message = "bqh,bsh->bqs"}> : () -> ()
    %cst_32 = arith.constant dense<0.000000e+00> : vector<2x1x8xf32>
    %80 = tpu.matmul %79, %21, %cst_32 {dimension_numbers = #tpu.dot_dimension_numbers<[2], [2], [1], [1], [0, 0, 0, 1, 1, 1], [0], [0]>} : vector<2x1x16xbf16>, vector<2x8x16xbf16>, vector<2x1x8xf32> -> vector<2x1x8xf32>
    "tpu.trace_stop"() : () -> ()
    %81 = vector.shape_cast %80 : vector<2x1x8xf32> to vector<2x8xf32>
    %82 = math.tanh %81 : vector<2x8xf32>
    %83 = arith.addf %82, %26 : vector<2x8xf32>
    %84 = tpu.concatenate %78, %83 in 1 : vector<2x32xf32>, vector<2x8xf32> -> vector<2x40xf32>
    %cst_33 = arith.constant dense<0xFF800000> : vector<2xf32>
    %85 = vector.multi_reduction <maximumf>, %84, %cst_33 [1] : vector<2x40xf32> to vector<2xf32>
    %86 = vector.shape_cast %85 : vector<2xf32> to vector<2x1xf32>
    %87 = vector.broadcast %86 : vector<2x1xf32> to vector<2x40xf32>
    %88 = arith.subf %84, %87 : vector<2x40xf32>
    %89 = math.exp %88 : vector<2x40xf32>
    %cst_34 = arith.constant dense<0.000000e+00> : vector<2xf32>
    %90 = vector.multi_reduction <add>, %89, %cst_34 [1] : vector<2x40xf32> to vector<2xf32>
    %91 = vector.shape_cast %90 : vector<2xf32> to vector<2x1xf32>
    %92 = tpu.reciprocal %91 {approx = true} : vector<2x1xf32> -> vector<2x1xf32>
    %93 = vector.broadcast %92 : vector<2x1xf32> to vector<2x40xf32>
    %94 = arith.mulf %89, %93 : vector<2x40xf32>
    %95 = vector.extract_strided_slice %94 {offsets = [0, 0], sizes = [2, 32], strides = [1, 1]} : vector<2x40xf32> to vector<2x32xf32>
    %96 = vector.extract_strided_slice %94 {offsets = [0, 32], sizes = [2, 8], strides = [1, 1]} : vector<2x40xf32> to vector<2x8xf32>
    %cst_35 = arith.constant 9.99999974E-5 : f32
    %97 = vector.broadcast %cst_35 : f32 to vector<2x12xf32>
    %98 = tpu.concatenate %95, %97 in 1 : vector<2x32xf32>, vector<2x12xf32> -> vector<2x44xf32>
    %99 = arith.truncf %96 : vector<2x8xf32> to vector<2x8xbf16>
    %100 = vector.shape_cast %99 : vector<2x8xbf16> to vector<2x1x8xbf16>
    "tpu.trace_start"() <{level = 10 : i32, message = "bqs,bsv->bqv"}> : () -> ()
    %cst_36 = arith.constant dense<0.000000e+00> : vector<2x1x44xf32>
    %101 = tpu.matmul %100, %33, %cst_36 {dimension_numbers = #tpu.dot_dimension_numbers<[2], [1], [1], [2], [0, 0, 0, 1, 1, 2], [0], [0]>} : vector<2x1x8xbf16>, vector<2x8x44xbf16>, vector<2x1x44xf32> -> vector<2x1x44xf32>
    "tpu.trace_stop"() : () -> ()
    %102 = vector.shape_cast %101 : vector<2x1x44xf32> to vector<2x44xf32>
    %103 = arith.addf %98, %102 : vector<2x44xf32>
    %cst_37 = arith.constant dense<0.000000e+00> : vector<2xf32>
    %104 = vector.multi_reduction <add>, %41, %cst_37 [1] : vector<2x8xf32> to vector<2xf32>
    %105 = vector.shape_cast %104 : vector<2xf32> to vector<2x1xf32>
    %cst_38 = arith.constant 1.000000e+00 : f32
    %106 = vector.broadcast %cst_38 : f32 to vector<2x1xf32>
    %107 = arith.maximumf %105, %106 : vector<2x1xf32>
    %108 = vector.broadcast %107 : vector<2x1xf32> to vector<2x8xf32>
    %109 = arith.divf %41, %108 : vector<2x8xf32>
    %110 = arith.mulf %96, %109 : vector<2x8xf32>
    %111 = arith.truncf %110 : vector<2x8xf32> to vector<2x8xbf16>
    %112 = vector.shape_cast %111 : vector<2x8xbf16> to vector<2x1x8xbf16>
    "tpu.trace_start"() <{level = 10 : i32, message = "bqs,bsk->bqk"}> : () -> ()
    %cst_39 = arith.constant dense<0.000000e+00> : vector<2x1x32xf32>
    %113 = tpu.matmul %112, %1, %cst_39 {dimension_numbers = #tpu.dot_dimension_numbers<[2], [1], [1], [2], [0, 0, 0, 1, 1, 2], [0], [0]>} : vector<2x1x8xbf16>, vector<2x8x32xbf16>, vector<2x1x32xf32> -> vector<2x1x32xf32>
    "tpu.trace_stop"() : () -> ()
    %114 = vector.shape_cast %113 : vector<2x1x32xf32> to vector<2x32xf32>
    %cst_40 = arith.constant 0.000000e+00 : f32
    %115 = vector.broadcast %cst_40 : f32 to vector<2x84xf32>
    %116 = tpu.concatenate %103, %115 in 1 : vector<2x44xf32>, vector<2x84xf32> -> vector<2x128xf32>
    %c0_41 = arith.constant 0 : index
    %c0_42 = arith.constant 0 : index
    %117 = vector.load %arg12[%c0_41, %c0_42] : memref<2x128xf32, #tpu.memory_space<vmem>>, vector<2x128xf32>
    tpu.vector_store %arg12[%c0_41, %c0_42], %116 {strides = array<i32>} : memref<2x128xf32, #tpu.memory_space<vmem>>, vector<2x128xf32>,
    %cst_43 = arith.constant 0.000000e+00 : f32
    %118 = vector.broadcast %cst_43 : f32 to vector<2x112xf32>
    %119 = tpu.concatenate %74, %118 in 1 : vector<2x16xf32>, vector<2x112xf32> -> vector<2x128xf32>
    %c0_44 = arith.constant 0 : index
    %c0_45 = arith.constant 0 : index
    %120 = vector.load %arg13[%c0_44, %c0_45] : memref<2x128xf32, #tpu.memory_space<vmem>>, vector<2x128xf32>
    tpu.vector_store %arg13[%c0_44, %c0_45], %119 {strides = array<i32>} : memref<2x128xf32, #tpu.memory_space<vmem>>, vector<2x128xf32>,
    %cst_46 = arith.constant 0.000000e+00 : f32
    %121 = vector.broadcast %cst_46 : f32 to vector<2x96xf32>
    %122 = tpu.concatenate %114, %121 in 1 : vector<2x32xf32>, vector<2x96xf32> -> vector<2x128xf32>
    %c0_47 = arith.constant 0 : index
    %c0_48 = arith.constant 0 : index
    %123 = vector.load %arg14[%c0_47, %c0_48] : memref<2x128xf32, #tpu.memory_space<vmem>>, vector<2x128xf32>
    tpu.vector_store %arg14[%c0_47, %c0_48], %122 {strides = array<i32>} : memref<2x128xf32, #tpu.memory_space<vmem>>, vector<2x128xf32>,
    return
  }
}

</mosaic_0001>

<bundles_post_ra>
// kernel: tpu_custom_call.1
= control target key start
LH: loop header
LB: loop body
LE: loop exit
PB: predicated region body
PF: predicated region fallthrough
CT: control target
= control target key end

     0   :  { %20 = vsyncpa [#allocation5], 0  ;;  %s1114_s0 = inlined_call_operand.hbm [shape: s32[2], index: 0, kind: input, shape index: {}]   ;;  %s1115_s1 = inlined_call_operand.hbm [shape: bf16[2,16], index: 1, kind: input, shape index: {}]   ;;  %s1116_s2 = inlined_call_operand.hbm [shape: f32[2,8,32], index: 2, kind: input, shape index: {}]   ;;  %s1117_s3 = inlined_call_operand.vmem [shape: s32[2,8], index: 3, kind: input, shape index: {}]   ;;  %s1118_s4 = inlined_call_operand.vmem [shape: bf16[64,64], index: 4, kind: input, shape index: {}]   ;;  %s1119_s5 = inlined_call_operand.vmem [shape: f32[1,64], index: 5, kind: input, shape index: {}]   ;;  %s1120_s6 = inlined_call_operand.vmem [shape: bf16[32,16], index: 6, kind: input, shape index: {}]   ;;  %s1121_s7 = inlined_call_operand.vmem [shape: f32[1,16], index: 7, kind: input, shape index: {}]   ;;  %s1122_s8 = inlined_call_operand.vmem [shape: bf16[16,32], index: 8, kind: input, shape index: {}]   ;;  %s1123_s9 = inlined_call_operand.vmem [shape: f32[1,32], index: 9, kind: input, shape index: {}]   ;;  %s1124_s10 = inlined_call_operand.vmem [shape: bf16[32,16], index: 10, kind: input, shape index: {}]   ;;  %s1125_s11 = inlined_call_operand.vmem [shape: f32[1,16], index: 11, kind: input, shape index: {}]   ;;  %s1126_s12 = inlined_call_operand.hbm [shape: f32[2,128], index: 12, kind: output, shape index: {0}]   ;;  %s1127_s13 = inlined_call_operand.hbm [shape: f32[2,128], index: 13, kind: output, shape index: {1}]   ;;  %s1128_s14 = inlined_call_operand.hbm [shape: f32[2,128], index: 14, kind: output, shape index: {2}]  }
   0x1   :  { %21 = vsyncpa [#allocation3], 0 }
   0x2   :  { %22 = vsyncpa [#allocation8], 0 }
   0x3   :  { %23 = vsyncpa [#allocation4], 0 }
   0x4   :  { %24 = vsyncpa [#allocation11], 0  ;;  %s30_s15 = sshll.u32 %s1114_s0, 4  ;;  %s39_s18 = sshll.u32 %s1115_s1, 4  ;;  %s31_s15 = int_to_ptr.hbm [resolvable:$true] %s30_s15  ;;  %s40_s18 = int_to_ptr.hbm [resolvable:$true] %s39_s18 }
   0x5   :  { %s897_s19 = smov [#allocation2]   ;;  %s898_s20 = smov [#allocation6]  }
   0x6   :  { %33 = dma.hbm_to_smem %s31_s15, 16, %s897_s19, [#allocation5]  }
   0x7   :  { %s41_s21 = sshll.u32 %s898_s20, 4  ;;  %s49_s24 = sshll.u32 %s1116_s2, 4  ;;  %s42_s21 = int_to_ptr.vmem [resolvable:$true] %s41_s21  ;;  %s50_s24 = int_to_ptr.hbm [resolvable:$true] %s49_s24 }
   0x8   :  { %44 = dma.hbm_to_vmem [thread:$0]  %s40_s18, 16, %s42_s21, [#allocation3]  }
   0x9   :  { %s899_s25 = smov [#allocation7]   ;;  %s900_s0 = smov 128  }
   0xa   :  { %s51_s26 = sshll.u32 %s899_s25, 4  ;;  %s901_s27 = smov 8   ;;  %s52_s26 = int_to_ptr.vmem [resolvable:$true] %s51_s26 }
   0xb   :  { %57 = dma.hbm_to_vmem [thread:$0]  %s50_s24, 256, %s52_s26, [#allocation8], %s900_s0, %s900_s0, %s901_s27  }
   0xc   :  { %887 = dma.done.wait [#allocation5], 16  }
   0xd   :  { %888 = vsyncadd [#allocation5], 4294967280 }
   0xe   :  { %889 = dma.done.wait [#allocation3], 16  }
   0xf   :  { %890 = vsyncadd [#allocation3], 4294967280 }
  0x10   :  { %891 = dma.done.wait [#allocation8], 256  }
  0x11   :  { %892 = vsyncadd [#allocation8], 4294967040 }
  0x12   :  { %88 = sfence }
  0x13   :  { %v706_v0 = vld [vmem:[%s1120_s6 + $0x8] sm:$0xff]  ;;  %v705_v2 = vld [vmem:[%s1120_s6] sm:$0xff]  ;;  %vm109_vm0 = vcmask 1041409   ;;  %vm124_vm1 = vcmask 261120   ;;  %s902_s15 = smov 16   ;;  %s903_s16 = smov 48  }
  0x14   :  { %v999_v1 = vld [vmem:[#allocation7] sm:$0xff]  ;;  %v1004_v3 = vld [vmem:[#allocation7 + $0x8] sm:$0xff]  ;;  %134 = vmatpush.bf16.msra.mxu0 %v706_v0  ;;  %v731_v12 = vld [vmem:[%s1121_s7] ss:$0 sm:$0xff]  ;;  %vm237_vm2 = vcmask 130048   ;;  %vm241_vm3 = vcmask 392192  }
  0x15   :  { %v1008_v4 = vpack.c.bf16 %v999_v1, %v999_v1  ;;  %v1012_v5 = vpack.c.bf16 %v1004_v3, %v1004_v3  ;;  %v712_v19 = vld [vmem:[%s1118_s4 + $0x18] sm:$0xff]  ;;  %v711_v20 = vld [vmem:[%s1118_s4 + $0x10] sm:$0xff]  ;;  %v710_v21 = vld [vmem:[%s1118_s4 + $0x8] sm:$0xff]  ;;  %vm271_vm4 = vcmask 523264   ;;  %s904_s26 = smov 80   ;;  %v141_v48 = vpack.c.bf16 %v1004_v3, %v999_v1  ;;  %s906_s28 = smov 112  }
  0x16   :  { %278 = vmatpush.bf16.msra.mxu2 %v712_v19  ;;  %v709_v22 = vld [vmem:[%s1118_s4] sm:$0xff]  ;;  %s905_s4 = smov 32   ;;  %v708_v46 = vld [vmem:[%s1124_s10 + $0x8] sm:$0xff]  ;;  %vm213_vm9 = vcmask 1040384   ;;  %s671_s30 = sld [smem:[#allocation2 + $0x1]]  ;;  %vm505_vm11 = vcmask 58368  }
  0x17   :  { %v105_v6 = vunpack.c.l.b16 %v1008_v4  ;;  %v106_v7 = vunpack.c.l.b16 %v1012_v5  ;;  %v218_v23 = vld [vmem:[#allocation6] sm:$0x1]  ;;  %171 = vmatpush.bf16.msra.mxu1 %v708_v46  ;;  %vm429_vm13 = vcmask 320512   ;;  %s909_s17 = smov [#allocation10]   ;;  %s619_s7 = sshll.u32 %s1127_s13, 4  ;;  %s620_s7 = int_to_ptr.hbm [resolvable:$true] %s619_s7 }
  0x18   :  { %135 = vmatpush.bf16.msra.mxu0 %v705_v2  ;;  %v240_v24 = vsel %vm237_vm2, %v218_v23, 0  ;;  %v732_v27 = vld [vmem:[%s1119_s5] ss:$0 sm:$0xff]  ;;  %s617_s18 = sshll.u32 %s909_s17, 4  ;;  %s910_s21 = smov [#allocation9]   ;;  %s618_s18 = int_to_ptr.vmem [resolvable:$true] %s617_s18 }
  0x19   :  { %v107_v8 = vrot.slane %v105_v6, 7  ;;  %v108_v9 = vrot.slane %v106_v7, 6  ;;  %v707_v47 = vld [vmem:[%s1124_s10] sm:$0xff]  ;;  %s606_s22 = sshll.u32 %s910_s21, 4  ;;  %s608_s25 = sshll.u32 %s1126_s12, 4  ;;  %s607_s22 = int_to_ptr.vmem [resolvable:$true] %s606_s22  ;;  %s609_s25 = int_to_ptr.hbm [resolvable:$true] %s608_s25 }
  0x1a   :  { %279 = vmatpush.bf16.msra.mxu2 %v711_v20  ;;  %v713_v52 = vld [vmem:[%s1122_s8] sm:$0xff]  ;;  %s911_s13 = smov [#allocation12]   ;;  %s630_s5 = sshll.u32 %s1128_s14, 4  ;;  %s631_s5 = int_to_ptr.hbm [resolvable:$true] %s630_s5 }
  0x1b   :  { %v110_v10 = vsel %vm109_vm0, %v108_v9, %v107_v8  ;;  %172 = vmatpush.bf16.msra.mxu1 %v707_v47  ;;  %354 = vmatpush.bf16.msra.mxu3 %v713_v52  ;;  %v733_v8 = vld [vmem:[%s1125_s11] ss:$0 sm:$0xff]  ;;  %v185_v52 = vlaneseq }
  0x1c   :  { %v111_v11 = vpack.c.b16 %v110_v10, %v110_v10  ;;  %v94_v23 = vld [vmem:[%s1117_s3] sm:$0x3]  ;;  %s209_s3 = sld [smem:[#allocation2]] }
  0x1d   :  { %vm183_vm10 = vcmp.eq.s32.totalorder %v94_v23, 0 }
  0x1e   :  { %659 = vmatmul.msk.bf16.vlgmr.msra.gmra.mxu0 %vm124_vm1, %v111_v11  ;;  %280 = vmatpush.bf16.msra.mxu2 %v710_v21 }
  0x1f   :  { %668 = vmatmul.msk.bf16.vlgmr.msra.gmra.mxu1 %vm124_vm1, %v141_v48 }
  0x22   :  { %281 = vmatpush.bf16.msra.mxu2 %v709_v22 }
  0x9b   :  { %v137_v13 = vpop.f32.mrf.mxu0 }
  0x9c   :  { %v138_v14 = vadd.f32 %v731_v12, %v137_v13  ;;  %v174_v7 = vpop.f32.mrf.mxu1 }
  0x9d   :  { %v175_v10 = vadd.f32 %v733_v8, %v174_v7 }
  0x9e   :  { %324 = vrot.lane.b32.xlu2 %v138_v14, %s902_s15  ;;  %v231_v15 = vpack.c.bf16 %v138_v14, %v138_v14 }
  0xa0   :  { %v233_v16 = vunpack.c.l.b16 %v231_v15 }
  0xa2   :  { %v234_v17 = vpack.c.b16 %v233_v16, %v233_v16 }
  0xa3   :  { %v139_v18 = vpop.f32.mrf.mxu0 }
  0xa4   :  { %235 = vrot.lane.b32.xlu0 %v234_v17, %s903_s16  ;;  %v176_v9 = vpop.f32.mrf.mxu1 }
  0xa5   :  { %v177_v11 = vadd.f32 %v733_v8, %v176_v9  ;;  %v186_v9 = vand.u32 127, %v185_v52 }
  0xf8   :  { %v325_v54 = vpop.permute.xlu2 %324 }
 0x116   :  { %v236_v25 = vpop.permute.xlu0 %235 }
 0x117   :  { %v243_v26 = vsel %vm241_vm3, %v240_v24, %v236_v25  ;;  %v907_v25 = vmov 0.0  }
 0x118   :  { %689 = vmatmul.msk.bf16.vlgmr.msra.gmra.mxu2 %vm271_vm4, %v243_v26  ;;  %v184_v26 = vsel %vm183_vm10, -1000.0, %v907_v25 }
 0x19b   :  { %v283_v28 = vpop.f32.mrf.mxu2 }
 0x19c   :  { %v284_v29 = vadd.f32 %v732_v27, %v283_v28  ;;  %v416_v28 = vrot.slane %v184_v26, 1 }
 0x19e   :  { %307 = vrot.lane.b32.xlu0 %v284_v29, %s904_s26  ;;  %v690_v31 = vmul.f32 -1.442695, %v284_v29  ;;  %s628_s26 = sshll.u32 %s911_s13, 4  ;;  %s629_s26 = int_to_ptr.vmem [resolvable:$true] %s628_s26 }
 0x1a0   :  { %735 = vpow2.f32 %v690_v31 }
 0x1a3   :  { %v285_v30 = vpop.f32.mrf.mxu2 }
 0x1a6   :  { %v736_v32 = vpop.eup %735 }
 0x1a7   :  { %v290_v33 = vadd.f32 1.0, %v736_v32 }
 0x1a9   :  { %737 = vrcp.f32 %v290_v33  ;;  %v302_v39 = vand.u32 2147483648, %v290_v33  ;;  %vm296_vm6 = vweird.f32 %v290_v33  ;;  %v300_v40 = vand.u32 2147483647, %v290_v33 }
 0x1ab   :  { %v303_v42 = vor.u32 1.1754944e-38, %v302_v39  ;;  %vm301_vm8 = vcmp.eq.f32.partialorder %v300_v40, 8.507059e+37 }
 0x1af   :  { %v738_v34 = vpop.eup %737 }
 0x1b0   :  { %v292_v35 = vmul.f32 %v738_v34, %v290_v33  ;;  %vm297_vm5 = vweird.f32 %v738_v34 }
 0x1b1   :  { %vm298_vm7 = vmor %vm296_vm6, %vm297_vm5  ;;  %vm459_vm6 = vcmask 1043456  }
 0x1b2   :  { %v293_v36 = vsub.f32 1.0, %v292_v35 }
 0x1b4   :  { %v294_v37 = vmul.f32 %v738_v34, %v293_v36 }
 0x1b6   :  { %v295_v38 = vadd.f32 %v738_v34, %v294_v37  ;;  %v210_v37 = vstv %s209_s3 }
 0x1b8   :  { %v299_v41 = vsel %vm298_vm7, %v738_v34, %v295_v38  ;;  %v212_v38 = vstv %s671_s30 }
 0x1b9   :  { %v304_v44 = vsel %vm301_vm8, %v303_v42, %v299_v41  ;;  %v214_v39 = vsel %vm213_vm9, %v210_v37, %v212_v38  ;;  %v734_v42 = vld [vmem:[%s1123_s9] ss:$0 sm:$0xff]  ;;  %s908_s9 = smov 96   ;;  %vm455_vm8 = vcmask 64512  }
 0x1ba   :  { %v317_v53 = vsub.f32 1.0, %v304_v44  ;;  %v327_v56 = vmul.f32 %v325_v54, %v304_v44  ;;  %vm215_vm12 = vcmp.eq.s32.totalorder %v94_v23, %v214_v39  ;;  %v547_v39 = vsel %vm459_vm6, %v1008_v4, 0 }
 0x1bb   :  { %v672_v40 = vsel %vm215_vm12, 1.0, %v907_v25 }
 0x1bc   :  { %v506_v41 = vsel %vm505_vm11, %v672_v40, 0.0 }
 0x210   :  { %v308_v43 = vpop.permute.xlu0 %307 }
 0x211   :  { %v310_v45 = vmul.f32 %v308_v43, %v304_v44 }
 0x213   :  { %312 = vrot.lane.b32.xlu1 %v310_v45, %s905_s4 }
 0x285   :  { %v313_v49 = vpop.permute.xlu1 %312 }
 0x286   :  { %v315_v50 = vadd.f32 %v313_v49, %v284_v29 }
 0x288   :  { %739 = vtanh.f32 %v315_v50 }
 0x289   :  { %741 = vtanh.f32 %v175_v10 }
 0x28a   :  { %743 = vtanh.f32 %v177_v11 }
 0x28e   :  { %v740_v51 = vpop.eup %739 }
 0x28f   :  { %319 = vrot.lane.b32.xlu1 %v740_v51, %s906_s28  ;;  %v742_v12 = vpop.eup %741 }
 0x290   :  { %v744_v13 = vpop.eup %743  ;;  %v181_v14 = vpack.c.bf16 %v742_v12, %v742_v12 }
 0x291   :  { %v182_v15 = vpack.c.bf16 %v744_v13, %v744_v13 }
 0x292   :  { %v375_v16 = vsel %vm237_vm2, %v181_v14, 0 }
 0x293   :  { %v398_v17 = vsel %vm237_vm2, %v182_v15, 0  ;;  %384 = vmatpush.bf16.xpose.msrb.mxu3 %v375_v16 }
 0x294   :  { %407 = vmatpush.bf16.xpose.msrb.mxu0 %v398_v17 }
 0x301   :  { %v320_v55 = vpop.permute.xlu1 %319 }
 0x302   :  { %v322_v57 = vmul.f32 %v320_v55, %v317_v53  ;;  %v189_v53 = vshrl.u32 %v185_v52, 7 }
 0x304   :  { %v1051_v58 = vadd.f32 %v327_v56, %v322_v57  ;;  %729 = vset.pattern.permute.xlu0 %v189_v53  ;;  %730 = vset.pattern.permute.xlu1 %v189_v53 }
 0x306   :  { %v329_v59 = vpack.c.bf16 %v1051_v58, %v1051_v58 }
 0x308   :  { %v360_v60 = vrot.slane %v329_v59, 3  ;;  %v334_v61 = vunpack.c.l.b16 %v329_v59 }
 0x30a   :  { %v335_v62 = vpack.c.b16 %v334_v61, %v334_v61  ;;  %v363_v63 = vsel %vm213_vm9, %v329_v59, %v360_v60  ;;  %v194_v59 = vperm.slane %v94_v23, 1  ;;  %v187_v60 = vperm.slane %v94_v23, 0 }
 0x30b   :  { %v696_v0 = vpack.i.b16 %v363_v63, %v363_v63  ;;  %v366_v1 = vunpack.i.h.s16 %v363_v63 }
 0x30c   :  { %336 = vrot.lane.b32.xlu2 %v335_v62, %s906_s28 }
 0x30d   :  { %v368_v2 = vperm.slane %v696_v0, 0  ;;  %v390_v3 = vpack.i.b16 %v366_v1, %v366_v1 }
 0x30f   :  { %369 = vrot.lane.b32.xlu0 %v368_v2, %s906_s28  ;;  %v391_v6 = vperm.slane %v390_v3, 0 }
 0x311   :  { %392 = vrot.lane.b32.xlu1 %v391_v6, %s906_s28 }
 0x33b   :  { %507 = vadd.xlane.f32.xlu1 %v506_v41 }
 0x354   :  { %192 = vperm.xlu1 %730, %v187_v60  }
 0x366   :  { %v337_v18 = vpop.permute.xlu2 %336 }
 0x367   :  { %695 = vmatmul.msk.bf16.vlgmr.msra.gmra.mxu3 %vm237_vm2, %v337_v18 }
 0x368   :  { %556 = vmatpush.bf16.msra.mxu3 %v547_v39 }
 0x381   :  { %v370_v19 = vpop.permute.xlu0 %369 }
 0x382   :  { %697 = vmatmul.msk.bf16.vlgmr.msrb.gmra.mxu3 %vm237_vm2, %v370_v19 }
 0x383   :  { %v393_v20 = vpop.permute.xlu1 %392 }
 0x384   :  { %698 = vmatmul.msk.bf16.vlgmr.msrb.gmra.mxu0 %vm237_vm2, %v393_v20 }
 0x3ae   :  { %v508_v47 = vpop.xlane.xlu1 %507 }
 0x3af   :  { %v509_v49 = vmax.f32 %v508_v47, 1.0 }
 0x3b1   :  { %vm515_vm14 = vweird.f32 %v509_v49  ;;  %v521_v63 = vand.u32 2147483648, %v509_v49  ;;  %v519_v1 = vand.u32 2147483647, %v509_v49 }
 0x3b3   :  { %v522_v2 = vor.u32 1.1754944e-38, %v521_v63  ;;  %vm520_vm4 = vcmp.eq.f32.partialorder %v519_v1, 8.507059e+37 }
 0x3ea   :  { %v356_v21 = vpop.f32.mrf.mxu3 }
 0x3eb   :  { %v357_v43 = vadd.f32 %v734_v42, %v356_v21 }
 0x3f2   :  { %v358_v22 = vpop.f32.mrf.mxu3 }
 0x401   :  { %v409_v24 = vpop.f32.mrf.mxu0 }
 0x402   :  { %745 = vtanh.f32 %v409_v24 }
 0x405   :  { %v386_v27 = vpop.f32.mrf.mxu3 }
 0x406   :  { %747 = vtanh.f32 %v386_v27 }
 0x407   :  { %749 = vrcp.f32 %v509_v49 }
 0x408   :  { %v746_v29 = vpop.eup %745 }
 0x409   :  { %v411_v30 = vpop.f32.mrf.mxu0  ;;  %v420_v31 = vadd.f32 %v746_v29, %v416_v28 }
 0x40b   :  { %v423_v35 = vrot.slane %v420_v31, 7 }
 0x40c   :  { %v748_v32 = vpop.eup %747 }
 0x40d   :  { %v388_v33 = vpop.f32.mrf.mxu3  ;;  %v419_v34 = vadd.f32 %v748_v32, %v184_v26  ;;  %v750_v54 = vpop.eup %749 }
 0x40e   :  { %v511_v57 = vmul.f32 %v750_v54, %v509_v49  ;;  %vm516_vm15 = vweird.f32 %v750_v54 }
 0x40f   :  { %v424_v36 = vsel %vm109_vm0, %v423_v35, %v419_v34  ;;  %vm517_vm3 = vmor %vm515_vm14, %vm516_vm15  ;;  %v193_v35 = vpop.permute.xlu1 %192 }
 0x410   :  { %425 = vrot.lane.b32.xlu2 %v424_v36, %s905_s4  ;;  %v512_v61 = vsub.f32 1.0, %v511_v57  ;;  %vm201_vm7 = vcmp.eq.s32.totalorder %v193_v35, %v186_v9 }
 0x411   :  { %v669_v36 = vsel %vm201_vm7, 1.0, %v907_v25 }
 0x412   :  { %v513_v62 = vmul.f32 %v750_v54, %v512_v61  ;;  %v207_v37 = vpack.c.bf16 %v669_v36, %v669_v36 }
 0x414   :  { %v514_v0 = vadd.f32 %v750_v54, %v513_v62  ;;  %v461_v38 = vsel %vm459_vm6, %v207_v37, 0 }
 0x415   :  { %470 = vmatpush.bf16.msrb.mxu1 %v461_v38 }
 0x416   :  { %v518_v3 = vsel %vm517_vm3, %v750_v54, %v514_v0 }
 0x417   :  { %v523_v6 = vsel %vm520_vm4, %v522_v2, %v518_v3 }
 0x418   :  { %v524_v7 = vmul.f32 %v672_v40, %v523_v6  ;;  %v570_v40 = vsel %vm459_vm6, %v1012_v5, 0 }
 0x419   :  { %579 = vmatpush.bf16.msra.mxu0 %v570_v40 }
 0x46a   :  { %v426_v44 = vpop.permute.xlu2 %425 }
 0x46b   :  { %v428_v45 = vsel %vm124_vm1, %v357_v43, %v426_v44 }
 0x46c   :  { %v430_v46 = vsel %vm429_vm13, %v428_v45, -inf }
 0x46d   :  { %431 = vmax.xlane.f32.xlu0 %v430_v46 }
 0x481   :  { %199 = vperm.xlu0 %729, %v194_v59  }
 0x4e0   :  { %v432_v48 = vpop.xlane.xlu0 %431 }
 0x4e1   :  { %v433_v50 = vsub.f32 %v428_v45, %v432_v48 }
 0x4e3   :  { %v434_v51 = vmul.f32 1.442695, %v433_v50 }
 0x4e5   :  { %751 = vpow2.f32 %v434_v51 }
 0x4eb   :  { %v752_v55 = vpop.eup %751 }
 0x4ec   :  { %v436_v56 = vsel %vm429_vm13, %v752_v55, 0.0 }
 0x4ed   :  { %437 = vadd.xlane.f32.xlu2 %v436_v56 }
 0x4f3   :  { %v200_v10 = vpop.permute.xlu0 %199 }
 0x4f4   :  { %vm202_vm5 = vcmp.eq.s32.totalorder %v200_v10, %v186_v9 }
 0x4f5   :  { %v670_v14 = vsel %vm202_vm5, 1.0, %v907_v25 }
 0x4f6   :  { %v208_v15 = vpack.c.bf16 %v670_v14, %v670_v14 }
 0x4f8   :  { %v484_v18 = vsel %vm459_vm6, %v208_v15, 0 }
 0x4f9   :  { %493 = vmatpush.bf16.msrb.mxu2 %v484_v18 }
 0x505   :  { %526 = vrot.lane.b32.xlu2 %v524_v7, %s905_s4 }
 0x560   :  { %v438_v8 = vpop.xlane.xlu2 %437 }
 0x561   :  { %753 = vrcp.f32 %v438_v8 }
 0x567   :  { %v754_v11 = vpop.eup %753 }
 0x568   :  { %v1082_v12 = vmul.f32 %v754_v11, %v752_v55  ;;  %v527_v13 = vpop.permute.xlu2 %526 }
 0x56a   :  { %v442_v16 = vpack.c.bf16 %v1082_v12, %v1082_v12  ;;  %v529_v17 = vmul.f32 %v527_v13, %v1082_v12  ;;  %v441_v46 = vsel %vm124_vm1, %v1082_v12, 0.0001 }
 0x56c   :  { %v530_v19 = vpack.c.bf16 %v529_v17, %v529_v17  ;;  %v444_v20 = vrot.slane %v442_v16, 3 }
 0x56e   :  { %v532_v21 = vrot.slane %v530_v19, 3  ;;  %v447_v22 = vsel %vm213_vm9, %v442_v16, %v444_v20 }
 0x56f   :  { %v450_v23 = vunpack.i.h.s16 %v447_v22  ;;  %v699_v31 = vpack.i.b16 %v447_v22, %v447_v22 }
 0x570   :  { %v535_v24 = vsel %vm213_vm9, %v530_v19, %v532_v21 }
 0x571   :  { %v476_v26 = vpack.i.b16 %v450_v23, %v450_v23  ;;  %v702_v27 = vpack.i.b16 %v535_v24, %v535_v24  ;;  %v538_v30 = vunpack.i.h.s16 %v535_v24  ;;  %v452_v33 = vperm.slane %v699_v31, 0 }
 0x573   :  { %v477_v28 = vperm.slane %v476_v26, 0  ;;  %v540_v29 = vperm.slane %v702_v27, 0  ;;  %v562_v32 = vpack.i.b16 %v538_v30, %v538_v30 }
 0x575   :  { %478 = vrot.lane.b32.xlu2 %v477_v28, %s908_s9  ;;  %541 = vrot.lane.b32.xlu1 %v540_v29, %s908_s9  ;;  %v563_v34 = vperm.slane %v562_v32, 0 }
 0x57d   :  { %453 = vrot.lane.b32.xlu2 %v452_v33, %s908_s9  ;;  %564 = vrot.lane.b32.xlu1 %v563_v34, %s908_s9 }
 0x585   :  { %589 = vrot.lane.b32.xlu2 %v1051_v58, %s906_s28 }
 0x5cf   :  { %v479_v41 = vpop.permute.xlu2 %478 }
 0x5d0   :  { %701 = vmatmul.msk.bf16.vlgmr.msrb.gmra.mxu2 %vm455_vm8, %v479_v41 }
 0x5d7   :  { %v454_v58 = vpop.permute.xlu2 %453 }
 0x5d8   :  { %700 = vmatmul.msk.bf16.vlgmr.msrb.gmra.mxu1 %vm455_vm8, %v454_v58 }
 0x5df   :  { %v590_v42 = vpop.permute.xlu2 %589 }
 0x5e0   :  { %v592_v25 = vsel %vm237_vm2, %v590_v42, 0.0  ;;  %vm585_vm2 = vcmask 359424  }
 0x5e1   :  { %593 = vst [vmem:[#allocation10] sm:$0x3] %v592_v25 }
 0x5e2   :  { %622 = dma.vmem_to_hbm [thread:$0]  %s618_s18, 32, %s620_s7, [#allocation11]  }
 0x5e7   :  { %v542_v43 = vpop.permute.xlu1 %541 }
 0x5e8   :  { %703 = vmatmul.msk.bf16.vlgmr.msra.gmra.mxu3 %vm455_vm8, %v542_v43 }
 0x5ef   :  { %v565_v44 = vpop.permute.xlu1 %564 }
 0x5f0   :  { %704 = vmatmul.msk.bf16.vlgmr.msra.gmra.mxu0 %vm455_vm8, %v565_v44 }
 0x653   :  { %v495_v4 = vpop.f32.mrf.mxu2 }
 0x654   :  { %v501_v5 = vrot.slane %v495_v4, 7 }
 0x655   :  { %v472_v45 = vpop.f32.mrf.mxu1 }
 0x656   :  { %v502_v47 = vsel %vm109_vm0, %v501_v5, %v472_v45 }
 0x657   :  { %v504_v48 = vadd.f32 %v502_v47, %v441_v46 }
 0x659   :  { %v586_v49 = vsel %vm585_vm2, %v504_v48, 0.0 }
 0x65a   :  { %587 = vst [vmem:[#allocation9] sm:$0x3] %v586_v49 }
 0x65b   :  { %v497_v50 = vpop.f32.mrf.mxu2  ;;  %611 = dma.vmem_to_hbm [thread:$0]  %s607_s22, 32, %s609_s25, [#allocation4]  }
 0x65d   :  { %v474_v51 = vpop.f32.mrf.mxu1 }
 0x66b   :  { %v558_v52 = vpop.f32.mrf.mxu3 }
 0x66d   :  { %v581_v53 = vpop.f32.mrf.mxu0 }
 0x66e   :  { %v596_v54 = vrot.slane %v581_v53, 7 }
 0x670   :  { %v597_v55 = vsel %vm109_vm0, %v596_v54, %v558_v52 }
 0x671   :  { %v599_v56 = vsel %vm124_vm1, %v597_v55, 0.0 }
 0x672   :  { %600 = vst [vmem:[#allocation12] sm:$0x3] %v599_v56 }
 0x673   :  { %v560_v57 = vpop.f32.mrf.mxu3  ;;  %633 = dma.vmem_to_hbm [thread:$0]  %s629_s26, 32, %s631_s5, [#allocation11]  }
 0x675   :  { %v583_v59 = vpop.f32.mrf.mxu0 }
 0x676   :  { %893 = dma.done.wait [#allocation4], 32  }
 0x677   :  { %894 = vsyncadd [#allocation4], 4294967264 }
 0x678   :  { %895 = dma.done.wait [#allocation11], 64  }
 0x679   :  { %896 = vsyncadd [#allocation11], 4294967232 }
 0x67a   :  { %646 = vsyncpa [#allocation3], 1 }
 0x67b   :  { %647 = vsyncpa [#allocation8], 1 }
 0x67c   :  { %648 = vsyncpa [#allocation4], 1 }
 0x67d   :  { %649 = vsyncpa [#allocation11], 1 }
 0x67e   :  { %650 = vsyncpa [#allocation5], 1 }

</bundles_post_ra>
